<compile_context>
chip_gen: v5e
topology: v5e:2x2
jax: 0.10.0
libtpu: 0.0.40
codegen_flags: <defaults>
</compile_context>

<pallas_src>
import jax
import jax.numpy as jnp
import numpy as np
from jax.experimental import pallas as pl
from jax.experimental.pallas import tpu as pltpu

EPS = 1e-5


def _round_up(x, mult):
    return ((x + mult - 1) // mult) * mult


# ----------------------------- Pass 1: conv matmul + batch statistics -----------------------------

def _make_pass1_kernel(inv_m):
    """inv_m = 1 / (N*Ho*Wo) — real element count, excludes M padding."""

    def kernel(wt_ref, p_ref, gamma_ref, beta_ref,      # inputs
               y_ref, scale_ref, shift_ref,             # outputs
               sum_ref, sq_ref):                        # VMEM scratch (persist across grid)
        i = pl.program_id(0)

        @pl.when(i == 0)
        def _():
            sum_ref[...] = jnp.zeros_like(sum_ref)
            sq_ref[...] = jnp.zeros_like(sq_ref)

        # Conv tile on the MXU: bf16 x bf16 -> f32 accumulate, [Cout, tm] (M on lanes).
        y = jnp.dot(wt_ref[...], p_ref[...], preferred_element_type=jnp.float32)
        y_ref[...] = y

        # Single-pass batch statistics per output channel, accumulated across M tiles.
        sum_ref[...] += jnp.sum(y, axis=1, keepdims=True)
        sq_ref[...] += jnp.sum(y * y, axis=1, keepdims=True)

        @pl.when(i == pl.num_programs(0) - 1)
        def _():
            mean = sum_ref[...] * inv_m
            var = jnp.maximum(sq_ref[...] * inv_m - mean * mean, 0.0)   # guard cancellation
            scale = gamma_ref[...] * jax.lax.rsqrt(var + EPS)
            scale_ref[...] = scale
            shift_ref[...] = beta_ref[...] - mean * scale

    return kernel


# ----------------------------- Pass 2: normalize + affine + ReLU -----------------------------

def _pass2_kernel(y_ref, scale_ref, shift_ref, o_ref):
    o_ref[...] = jnp.maximum(
        y_ref[...] * scale_ref[...] + shift_ref[...], 0.0
    ).astype(o_ref.dtype)


# ----------------------------- Wrapper -----------------------------

def _im2col_t_nchw(x_nchw, kh, kw, padding):
    """[N, Cin, H, W] -> transposed patches [K, M]; K order (di, dj, cin), M order (n, i, j)."""
    n, cin, h, w = x_nchw.shape
    xp = jnp.pad(x_nchw, ((0, 0), (0, 0), (padding, padding), (padding, padding)))
    ho = h + 2 * padding - kh + 1
    wo = w + 2 * padding - kw + 1
    cols = [xp[:, :, di:di + ho, dj:dj + wo]
            for di in range(kh) for dj in range(kw)]           # each [N, Cin, Ho, Wo]
    pat = jnp.stack(cols, axis=0)                              # [kh*kw, N, Cin, Ho, Wo]
    pat = jnp.transpose(pat, (0, 2, 1, 3, 4))                  # [kh*kw, Cin, N, Ho, Wo]
    return pat.reshape(kh * kw * cin, n * ho * wo), (n, ho, wo)


def conv_batch_relu(x_nchw, weight_oihw, bias, gamma, beta, padding=0, tm=256):
    """Forward of ConvBatchRelu: x [N,Cin,H,W] -> [N,Cout,Ho,Wo] (float32).

    `bias` is accepted for interface parity with nn.Conv2d but is unused: with
    training-mode BatchNorm the per-channel conv bias cancels exactly in the mean
    subtraction, so the output is identical.
    """
    del bias
    cout, cin, kh, kw = weight_oihw.shape
    k = kh * kw * cin

    patches_t, (n, ho, wo) = _im2col_t_nchw(x_nchw, kh, kw, padding)   # [K, M]
    m = n * ho * wo

    # weight [Cout, Cin, kh, kw] -> [Cout, kh, kw, Cin] -> [Cout, K] (matches patch K order)
    w_t = jnp.transpose(weight_oihw, (0, 2, 3, 1)).reshape(cout, k)

    # M tiling (lane axis): multiples of 128, padded with zero columns.
    tm = _round_up(max(128, min(tm, _round_up(m, 128))), 128)
    m_pad = _round_up(m, tm)
    patches_t = jnp.pad(patches_t, ((0, 0), (0, m_pad - m)))

    patches_t = patches_t.astype(jnp.bfloat16)     # bf16 into the MXU
    w_t = w_t.astype(jnp.bfloat16)
    gamma2 = gamma.reshape(cout, 1).astype(jnp.float32)
    beta2 = beta.reshape(cout, 1).astype(jnp.float32)

    grid = (m_pad // tm,)

    # VMEM budget: double-buffered patch/y tiles + resident W^T + per-channel vectors, with headroom.
    tile_bytes = 2 * (k * tm * 2) + 4 * (cout * tm * 4) + cout * k * 2 + 8 * cout * 4
    vmem_limit = int(min(max(4 * tile_bytes, 4 << 20), 48 << 20))

    # ---- pass 1: conv matmul tiles + accumulated batch stats -> y, scale, shift ----
    y_t, scale, shift = pl.pallas_call(
        _make_pass1_kernel(1.0 / float(m)),
        out_shape=(
            jax.ShapeDtypeStruct((cout, m_pad), jnp.float32),   # y (pre-BN conv output)
            jax.ShapeDtypeStruct((cout, 1), jnp.float32),       # scale = gamma * rsqrt(var+eps)
            jax.ShapeDtypeStruct((cout, 1), jnp.float32),       # shift = beta - mean*scale
        ),
        grid_spec=pltpu.PrefetchScalarGridSpec(
            num_scalar_prefetch=0,
            grid=grid,
            in_specs=[
                pl.BlockSpec((cout, k), lambda i: (0, 0)),      # W^T (resident)
                pl.BlockSpec((k, tm), lambda i: (0, i)),        # patch tile
                pl.BlockSpec((cout, 1), lambda i: (0, 0)),      # gamma
                pl.BlockSpec((cout, 1), lambda i: (0, 0)),      # beta
            ],
            out_specs=[
                pl.BlockSpec((cout, tm), lambda i: (0, i)),
                pl.BlockSpec((cout, 1), lambda i: (0, 0)),
                pl.BlockSpec((cout, 1), lambda i: (0, 0)),
            ],
            scratch_shapes=[pltpu.VMEM((cout, 1), jnp.float32),
                            pltpu.VMEM((cout, 1), jnp.float32)],
        ),
        compiler_params=pltpu.CompilerParams(
            dimension_semantics=("arbitrary",),     # stats accumulate sequentially over M tiles
            vmem_limit_bytes=vmem_limit,
        ),
        cost_estimate=pl.CostEstimate(
            flops=2 * m_pad * k * cout,
            transcendentals=cout,
            bytes_accessed=k * m_pad * 2 + cout * m_pad * 4 + cout * k * 2,
        ),
    )(w_t, patches_t, gamma2, beta2)

    # ---- pass 2: normalize + affine + ReLU, in place on y, lane-dense stores ----
    out_t = pl.pallas_call(
        _pass2_kernel,
        out_shape=jax.ShapeDtypeStruct((cout, m_pad), jnp.float32),
        grid_spec=pltpu.PrefetchScalarGridSpec(
            num_scalar_prefetch=0,
            grid=grid,
            in_specs=[
                pl.BlockSpec((cout, tm), lambda i: (0, i)),
                pl.BlockSpec((cout, 1), lambda i: (0, 0)),
                pl.BlockSpec((cout, 1), lambda i: (0, 0)),
            ],
            out_specs=pl.BlockSpec((cout, tm), lambda i: (0, i)),
        ),
        compiler_params=pltpu.CompilerParams(
            dimension_semantics=("parallel",),      # independent tiles -> both TCs on v7x
            vmem_limit_bytes=vmem_limit,
        ),
        input_output_aliases={0: 0},                # normalize y in place
        cost_estimate=pl.CostEstimate(
            flops=2 * m_pad * cout,
            transcendentals=0,
            bytes_accessed=2 * cout * m_pad * 4,
        ),
    )(y_t, scale, shift)

    out_t = out_t[:, :m]                             # drop M padding
    out = out_t.reshape(cout, n, ho, wo)
    return jnp.transpose(out, (1, 0, 2, 3))          # back to NCHW


# ----------------------------- Reference & test -----------------------------

def _reference(x_nchw, weight_oihw, bias, gamma, beta, padding):
    """Pure-JAX f32 reference: conv (with bias) + training-mode batchnorm + relu."""
    y = jax.lax.conv_general_dilated(
        x_nchw, weight_oihw, window_strides=(1, 1),
        padding=[(padding, padding), (padding, padding)],
        dimension_numbers=("NCHW", "OIHW", "NCHW"),
    ) + bias.reshape(1, -1, 1, 1)
    mean = jnp.mean(y, axis=(0, 2, 3), keepdims=True)
    var = jnp.mean((y - mean) ** 2, axis=(0, 2, 3), keepdims=True)
    y = (y - mean) / jnp.sqrt(var + EPS)
    y = y * gamma.reshape(1, -1, 1, 1) + beta.reshape(1, -1, 1, 1)
    return jnp.maximum(y, 0.0)


if __name__ == "__main__":
    # ConvBatchRelu(in_channels=4, out_channels=8, kernel_size=3, padding=1)
    N, CIN, H, W = 2, 4, 16, 16
    COUT, KH, KW, PAD = 8, 3, 3, 1

    key = jax.random.PRNGKey(0)
    kx, kw_, kb = jax.random.split(key, 3)

    x = jax.random.normal(kx, (N, CIN, H, W), dtype=jnp.float32)

    # Conv2d default-style uniform init; BN gamma=1, beta=0.
    fan_in = CIN * KH * KW
    bound = 1.0 / np.sqrt(fan_in)
    weight = jax.random.uniform(kw_, (COUT, CIN, KH, KW), minval=-bound, maxval=bound,
                                dtype=jnp.float32)
    bias = jax.random.uniform(kb, (COUT,), minval=-bound, maxval=bound, dtype=jnp.float32)
    gamma = jnp.ones((COUT,), dtype=jnp.float32)
    beta = jnp.zeros((COUT,), dtype=jnp.float32)

    out = conv_batch_relu(x, weight, bias, gamma, beta, padding=PAD, tm=256)
    out = jax.block_until_ready(out)

    ref = _reference(x, weight, bias, gamma, beta, PAD)
    # Tolerance covers bf16 quantization of the MXU operands (reference conv is f32).
    np.testing.assert_allclose(np.asarray(out), np.asarray(ref), atol=5e-2, rtol=5e-2)

    print("KERNEL_OK")
</pallas_src>

<mosaic_0001>
module attributes {stable_mosaic.version = 11 : i64} {
  func.func @kernel(%arg0: i32, %arg1: memref<8x36xbf16, #tpu.memory_space<vmem>>, %arg2: memref<36x256xbf16, #tpu.memory_space<vmem>>, %arg3: memref<8x1xf32, #tpu.memory_space<vmem>>, %arg4: memref<8x1xf32, #tpu.memory_space<vmem>>, %arg5: memref<8x256xf32, #tpu.memory_space<vmem>>, %arg6: memref<8x1xf32, #tpu.memory_space<vmem>>, %arg7: memref<8x1xf32, #tpu.memory_space<vmem>>, %arg8: memref<8x1xf32, #tpu.memory_space<vmem>>, %arg9: memref<8x1xf32, #tpu.memory_space<vmem>>) attributes {dimension_semantics = [#tpu.dimension_semantics<arbitrary>], iteration_bounds = array<i64: 2>, scalar_prefetch = 0 : i64, scratch_operands = 2 : i64, tpu.core_type = #tpu.core_type<tc>, window_params = [{pipeline_mode = #tpu.pipeline_mode<synchronous>, transform_indices = @transform_0, window_bounds = array<i64: 8, 36>}, {transform_indices = @transform_1, window_bounds = array<i64: 36, 256>}, {pipeline_mode = #tpu.pipeline_mode<synchronous>, transform_indices = @transform_2, window_bounds = array<i64: 8, 1>}, {pipeline_mode = #tpu.pipeline_mode<synchronous>, transform_indices = @transform_3, window_bounds = array<i64: 8, 1>}, {transform_indices = @transform_4, window_bounds = array<i64: 8, 256>}, {pipeline_mode = #tpu.pipeline_mode<synchronous>, transform_indices = @transform_5, window_bounds = array<i64: 8, 1>}, {pipeline_mode = #tpu.pipeline_mode<synchronous>, transform_indices = @transform_6, window_bounds = array<i64: 8, 1>}]} {
    %c0_i32 = arith.constant 0 : i32
    %0 = arith.cmpi eq, %arg0, %c0_i32 : i32
    %1 = arith.extui %0 : i1 to i32
    %c0_i32_0 = arith.constant 0 : i32
    %2 = arith.cmpi ne, %1, %c0_i32_0 : i32
    scf.if %2 {
      %cst_17 = arith.constant 0.000000e+00 : f32
      %21 = vector.broadcast %cst_17 : f32 to vector<8x1xf32>
      %c0_18 = arith.constant 0 : index
      %c0_19 = arith.constant 0 : index
      %22 = vector.load %arg8[%c0_18, %c0_19] : memref<8x1xf32, #tpu.memory_space<vmem>>, vector<8x1xf32>
      tpu.vector_store %arg8[%c0_18, %c0_19], %21 {strides = array<i32>} : memref<8x1xf32, #tpu.memory_space<vmem>>, vector<8x1xf32>,
      %cst_20 = arith.constant 0.000000e+00 : f32
      %23 = vector.broadcast %cst_20 : f32 to vector<8x1xf32>
      %c0_21 = arith.constant 0 : index
      %c0_22 = arith.constant 0 : index
      %24 = vector.load %arg9[%c0_21, %c0_22] : memref<8x1xf32, #tpu.memory_space<vmem>>, vector<8x1xf32>
      tpu.vector_store %arg9[%c0_21, %c0_22], %23 {strides = array<i32>} : memref<8x1xf32, #tpu.memory_space<vmem>>, vector<8x1xf32>,
    } else {
    }
    %c0 = arith.constant 0 : index
    %c0_1 = arith.constant 0 : index
    %3 = vector.load %arg1[%c0, %c0_1] : memref<8x36xbf16, #tpu.memory_space<vmem>>, vector<8x36xbf16>
    %c0_2 = arith.constant 0 : index
    %c0_3 = arith.constant 0 : index
    %4 = vector.load %arg2[%c0_2, %c0_3] : memref<36x256xbf16, #tpu.memory_space<vmem>>, vector<36x256xbf16>
    %cst = arith.constant dense<0.000000e+00> : vector<8x256xf32>
    %5 = tpu.matmul %3, %4, %cst {dimension_numbers = #tpu.dot_dimension_numbers<[1], [0], [0], [1], [0, 0, 1, 1], [], []>} : vector<8x36xbf16>, vector<36x256xbf16>, vector<8x256xf32> -> vector<8x256xf32>
    %c0_4 = arith.constant 0 : index
    %c0_5 = arith.constant 0 : index
    %6 = vector.load %arg5[%c0_4, %c0_5] : memref<8x256xf32, #tpu.memory_space<vmem>>, vector<8x256xf32>
    tpu.vector_store %arg5[%c0_4, %c0_5], %5 {strides = array<i32>} : memref<8x256xf32, #tpu.memory_space<vmem>>, vector<8x256xf32>,
    %c0_6 = arith.constant 0 : index
    %c0_7 = arith.constant 0 : index
    %7 = vector.load %arg8[%c0_6, %c0_7] : memref<8x1xf32, #tpu.memory_space<vmem>>, vector<8x1xf32>
    %cst_8 = arith.constant dense<0.000000e+00> : vector<8xf32>
    %8 = vector.multi_reduction <add>, %5, %cst_8 [1] : vector<8x256xf32> to vector<8xf32>
    %9 = vector.shape_cast %8 : vector<8xf32> to vector<8x1xf32>
    %10 = arith.addf %7, %9 : vector<8x1xf32>
    %c0_9 = arith.constant 0 : index
    %c0_10 = arith.constant 0 : index
    %11 = vector.load %arg8[%c0_9, %c0_10] : memref<8x1xf32, #tpu.memory_space<vmem>>, vector<8x1xf32>
    tpu.vector_store %arg8[%c0_9, %c0_10], %10 {strides = array<i32>} : memref<8x1xf32, #tpu.memory_space<vmem>>, vector<8x1xf32>,
    %c0_11 = arith.constant 0 : index
    %c0_12 = arith.constant 0 : index
    %12 = vector.load %arg9[%c0_11, %c0_12] : memref<8x1xf32, #tpu.memory_space<vmem>>, vector<8x1xf32>
    %13 = arith.mulf %5, %5 : vector<8x256xf32>
    %cst_13 = arith.constant dense<0.000000e+00> : vector<8xf32>
    %14 = vector.multi_reduction <add>, %13, %cst_13 [1] : vector<8x256xf32> to vector<8xf32>
    %15 = vector.shape_cast %14 : vector<8xf32> to vector<8x1xf32>
    %16 = arith.addf %12, %15 : vector<8x1xf32>
    %c0_14 = arith.constant 0 : index
    %c0_15 = arith.constant 0 : index
    %17 = vector.load %arg9[%c0_14, %c0_15] : memref<8x1xf32, #tpu.memory_space<vmem>>, vector<8x1xf32>
    tpu.vector_store %arg9[%c0_14, %c0_15], %16 {strides = array<i32>} : memref<8x1xf32, #tpu.memory_space<vmem>>, vector<8x1xf32>,
    %c1_i32 = arith.constant 1 : i32
    %18 = arith.cmpi eq, %arg0, %c1_i32 : i32
    %19 = arith.extui %18 : i1 to i32
    %c0_i32_16 = arith.constant 0 : i32
    %20 = arith.cmpi ne, %19, %c0_i32_16 : i32
    scf.if %20 {
      %c0_17 = arith.constant 0 : index
      %c0_18 = arith.constant 0 : index
      %21 = vector.load %arg8[%c0_17, %c0_18] : memref<8x1xf32, #tpu.memory_space<vmem>>, vector<8x1xf32>
      %cst_19 = arith.constant 0.001953125 : f32
      %22 = vector.broadcast %cst_19 : f32 to vector<8x1xf32>
      %23 = arith.mulf %21, %22 : vector<8x1xf32>
      %c0_20 = arith.constant 0 : index
      %c0_21 = arith.constant 0 : index
      %24 = vector.load %arg9[%c0_20, %c0_21] : memref<8x1xf32, #tpu.memory_space<vmem>>, vector<8x1xf32>
      %cst_22 = arith.constant 0.001953125 : f32
      %25 = vector.broadcast %cst_22 : f32 to vector<8x1xf32>
      %26 = arith.mulf %24, %25 : vector<8x1xf32>
      %27 = arith.mulf %23, %23 : vector<8x1xf32>
      %28 = arith.subf %26, %27 : vector<8x1xf32>
      %cst_23 = arith.constant 0.000000e+00 : f32
      %29 = vector.broadcast %cst_23 : f32 to vector<8x1xf32>
      %30 = arith.maximumf %28, %29 : vector<8x1xf32>
      %c0_24 = arith.constant 0 : index
      %c0_25 = arith.constant 0 : index
      %31 = vector.load %arg3[%c0_24, %c0_25] : memref<8x1xf32, #tpu.memory_space<vmem>>, vector<8x1xf32>
      %cst_26 = arith.constant 9.99999974E-6 : f32
      %32 = vector.broadcast %cst_26 : f32 to vector<8x1xf32>
      %33 = arith.addf %30, %32 : vector<8x1xf32>
      %34 = math.rsqrt %33 : vector<8x1xf32>
      %35 = arith.mulf %31, %34 : vector<8x1xf32>
      %c0_27 = arith.constant 0 : index
      %c0_28 = arith.constant 0 : index
      %36 = vector.load %arg6[%c0_27, %c0_28] : memref<8x1xf32, #tpu.memory_space<vmem>>, vector<8x1xf32>
      tpu.vector_store %arg6[%c0_27, %c0_28], %35 {strides = array<i32>} : memref<8x1xf32, #tpu.memory_space<vmem>>, vector<8x1xf32>,
      %c0_29 = arith.constant 0 : index
      %c0_30 = arith.constant 0 : index
      %37 = vector.load %arg4[%c0_29, %c0_30] : memref<8x1xf32, #tpu.memory_space<vmem>>, vector<8x1xf32>
      %38 = arith.mulf %23, %35 : vector<8x1xf32>
      %39 = arith.subf %37, %38 : vector<8x1xf32>
      %c0_31 = arith.constant 0 : index
      %c0_32 = arith.constant 0 : index
      %40 = vector.load %arg7[%c0_31, %c0_32] : memref<8x1xf32, #tpu.memory_space<vmem>>, vector<8x1xf32>
      tpu.vector_store %arg7[%c0_31, %c0_32], %39 {strides = array<i32>} : memref<8x1xf32, #tpu.memory_space<vmem>>, vector<8x1xf32>,
    } else {
    }
    return
  }
  func.func @transform_0(%arg0: i32) -> (i32, i32) {
    %c0_i32 = arith.constant 0 : i32
    %c0_i32_0 = arith.constant 0 : i32
    %c0_i32_1 = arith.constant 0 : i32
    return %c0_i32, %c0_i32_0 : i32, i32
  }
  func.func @transform_1(%arg0: i32) -> (i32, i32) {
    %c0_i32 = arith.constant 0 : i32
    %c0_i32_0 = arith.constant 0 : i32
    return %c0_i32, %arg0 : i32, i32
  }
  func.func @transform_2(%arg0: i32) -> (i32, i32) {
    %c0_i32 = arith.constant 0 : i32
    %c0_i32_0 = arith.constant 0 : i32
    %c0_i32_1 = arith.constant 0 : i32
    return %c0_i32, %c0_i32_0 : i32, i32
  }
  func.func @transform_3(%arg0: i32) -> (i32, i32) {
    %c0_i32 = arith.constant 0 : i32
    %c0_i32_0 = arith.constant 0 : i32
    %c0_i32_1 = arith.constant 0 : i32
    return %c0_i32, %c0_i32_0 : i32, i32
  }
  func.func @transform_4(%arg0: i32) -> (i32, i32) {
    %c0_i32 = arith.constant 0 : i32
    %c0_i32_0 = arith.constant 0 : i32
    return %c0_i32, %arg0 : i32, i32
  }
  func.func @transform_5(%arg0: i32) -> (i32, i32) {
    %c0_i32 = arith.constant 0 : i32
    %c0_i32_0 = arith.constant 0 : i32
    %c0_i32_1 = arith.constant 0 : i32
    return %c0_i32, %c0_i32_0 : i32, i32
  }
  func.func @transform_6(%arg0: i32) -> (i32, i32) {
    %c0_i32 = arith.constant 0 : i32
    %c0_i32_0 = arith.constant 0 : i32
    %c0_i32_1 = arith.constant 0 : i32
    return %c0_i32, %c0_i32_0 : i32, i32
  }
}

</mosaic_0001>

<bundles_post_ra>
// kernel: tpu_custom_call.1
= control target key start
LH: loop header
LB: loop body
LE: loop exit
PB: predicated region body
PF: predicated region fallthrough
CT: control target
= control target key end

     0   :  { %12 = vsyncpa [#allocation5], 0  ;;  %s876_s0 = inlined_call_operand.vmem [shape: bf16[8,36], index: 0, kind: input, shape index: {}]   ;;  %s877_s1 = inlined_call_operand.hbm [shape: bf16[36,512], index: 1, kind: input, shape index: {}]   ;;  %s878_s2 = inlined_call_operand.vmem [shape: f32[8,1], index: 2, kind: input, shape index: {}]   ;;  %s879_s3 = inlined_call_operand.vmem [shape: f32[8,1], index: 3, kind: input, shape index: {}]   ;;  %s880_s4 = inlined_call_operand.hbm [shape: f32[8,512], index: 4, kind: output, shape index: {0}]   ;;  %s881_s5 = inlined_call_operand.vmem [shape: f32[8,1], index: 5, kind: output, shape index: {1}]   ;;  %s882_s6 = inlined_call_operand.vmem [shape: f32[8,1], index: 6, kind: output, shape index: {2}]  }
   0x1   :  { %14 = vsyncpa [#allocation5 + $0x1], 0 }
   0x2   :  { %15 = vsyncpa [#allocation6], 0 }
   0x3   :  { %17 = vsyncpa [#allocation6 + $0x1], 0  ;;  %s719_s21 = smov 0   ;;  %s721_s22 = smov 0  }
   0x4   :  { %s723_s23 = smov 0   ;;  %s725_s24 = smov 0  }
   0x5 LB: > { %s740_s25 = sadd.s32 4294967295, %s678_s24   ;;  %s490_s26 = sadd.s32 4294967294, %s678_s24   ;;  %s678_s24 = sphi %s725_s24, %s890_s24   ;;  %s674_s23 = sphi %s723_s23, %s889_s23   ;;  %s670_s22 = sphi %s721_s22, %s888_s22   ;;  %s666_s21 = sphi %s719_s21, %s887_s21  }
   0x6   : > { %s744_s27 = sadd.s32 1, %s678_s24   ;;  %s51_s28 = sadd.s32 1, %s674_s23 }
   0x7   : > { %s48_s29 = ssub.s32 %s678_s24, %s744_s27  ;;  %p58_p0 = scmp.ne.s32.totalorder %s674_s23, %s670_s22 }
   0x8   : > { %p49_p1 = scmp.eq.s32.totalorder %s48_s29, 0  ;;  %p59_p2 = scmp.eq.s32.totalorder %s678_s24, 0 }
   0x9   : > { %p64_p3 = scmp.ne.s32.totalorder %s670_s22, %s666_s21  ;;  %p65_p4 = scmp.eq.s32.totalorder %s740_s25, 0 }
   0xa   : > { %s756_s30 = scalar_select %p49_p1, %s674_s23, %s51_s28  }
   0xb   : > { %p60_p5 = por %p59_p2, %p58_p0  ;;  %p758_p6 = por %p65_p4, %p64_p3 }
   0xc   : > { %p130_p7 = scmp.eq.s32.totalorder %s740_s25, 1  ;;  %p136_p8 = scmp.eq.s32.totalorder %s490_s26, 1 }
   0xd   : > { %p492_p9 = scmp.ge.s32.totalorder %s678_s24, 2  ;;  %p542_p10 = scmp.lt.s32.totalorder %s678_s24, 2 }
   0xe   : > { %p765_p11 = por %p130_p7, %p58_p0  ;;  %p769_p12 = por %p136_p8, %p64_p3 }
   0xf   : > { %s207_s10 = sand.u32 1, %s674_s23   ;;  %s522_s11 = sshll.u32 %s678_s24, 3 }
  0x10   : > { %s528_s12 = smul.u32 40, %s207_s10  ;;  %s216_s15 = scalar_lea.hbm %s877_s1, %s522_s11 }
  0x11   : > { %p778_p13 = pnand %p542_p10, %p60_p5  ;;  %s217_s17 = sshll.u32 %s216_s15, 4  ;;  %s218_s17 = int_to_ptr.hbm [resolvable:$true] %s217_s17 }
  0x12   : > { %s211_s18 = scalar_lea.vmem [#allocation4], %s528_s12  ;;  %p495_p0 = scmp.ge.s32.totalorder %s678_s24, 1 }
  0x13   : > { %s219_s19 = sshll.u32 %s211_s18, 4  ;;  %s208_s20 = scalar_lea.sflag [#allocation5], %s207_s10  ;;  %s220_s19 = int_to_ptr.vmem [resolvable:$true] %s219_s19 }
  0x14   : > { %s582_s26 = sshra.s32 %s218_s17, 4  ;;  %p586_p2 = pneg %p778_p13  ;;  %s583_s26 = int_to_ptr.hbm [resolvable:$true] %s582_s26 }
  0x15   : > { %s584_s28 = scalar_lea.hbm %s583_s26, 40  ;;  %s589_s13 = scalar_lea.hbm %s877_s1, 80 }
  0x16   : > { %p585_p1 = scmp.ne.s32.totalorder %s583_s26, %s584_s28  ;;  %p590_p5 = scmp.lt.s32.totalorder %s583_s26, %s877_s1 }
  0x17   : > { %p591_p7 = scmp.lt.s32.totalorder %s589_s13, %s584_s28 }
  0x18   : > { %p587_p3 = pnand %p586_p2, %p585_p1 }
  0x19   : > { %p592_p8 = por %p591_p7, %p590_p5 }
  0x1a   : > { %p588_p4 = pneg %p587_p3 }
  0x1c   : > { %p593_p10 = pnand %p592_p8, %p588_p4 }
  0x1e   : > { %596 = shalt.err (!%p593_p10)
}
  0x1f   : > { %s680_s10 = smov 256   ;;  %s681_s12 = smov 128  }
  0x20   : > { %s682_s18 = smov 8   ;;  %p227_p1 = scmp.lt.s32.totalorder %s678_s24, 3 }
  0x21   : > { %537 = dma.hbm_to_vmem [thread:$0]  (!%p778_p13), %s218_s17, 640, %s220_s19, %s208_s20, %s680_s10, %s681_s12, %s682_s18  }
  0x22   : > { %p228_p2 = pnand %p495_p0, %p227_p1 }
  0x23   : > { %s797_s29 = sand.u32 (!%p228_p2), 1, %s670_s22  }
  0x24   : > { %231 = sbr.rel (%p228_p2) target bundleno = 379 (0x17b), region = 36  ;;  %s234_s28 = scalar_lea.sflag (!%p228_p2), [#allocation5], %s797_s29 }
  0x25   : > { %s529_s26 = smul.u32 (!%p228_p2), 40, %s797_s29 }
  0x27   : > { %s801_s11 = scalar_lea.vmem (!%p228_p2), [#allocation4], %s529_s26 }
  0x29   : > { %657 = dma.done.wait (%p758_p6), %s234_s28, 640  }
  0x2a   : > { %659 = vsyncadd (%p758_p6), %s234_s28, 4294966656  ;;  %s496_s16 = sshll.u32 %s797_s29, 4  ;;  %p497_p13 = scmp.ne.s32.totalorder %s740_s25, 0 }
  0x2b   : > { %s808_s17 = scalar_lea.vmem [#allocation7], %s496_s16 }
  0x2c   : > { %273 = sbr.rel (%p497_p13) target bundleno = 52 (0x34), region = 44 }
  0x31   : > { %vm274_vm0 = vcmask 7168   ;;  %v683_v0 = vmov 0.0  }
  0x32   : > { %275 = vst.msk [vmem:[#allocation2] sm:$0xff] %vm274_vm0, %v683_v0 }
  0x33   : > { %276 = vst.msk [vmem:[#allocation3] sm:$0xff] %vm274_vm0, %v683_v0 }
  0x34 PF: > { %v282_v1 = vld [vmem:[%s801_s11 + $0x20] sm:$0x33]  ;;  %vm312_vm1 = vcmask 1041408   ;;  %v508_v4 = vld [vmem:[%s801_s11 + $0x10] sm:$0xf]  ;;  %vm308_vm2 = vcmask 293888  }
  0x35   : > { %v296_v2 = vunpack.c.l.b16 %v282_v1  ;;  %v297_v3 = vunpack.c.h.b16 %v282_v1  ;;  %v526_v7 = vld [vmem:[%s801_s11 + $0x14] sm:$0xf0]  ;;  %v525_v8 = vld [vmem:[%s801_s11 + $0x14] sm:$0xf]  ;;  %v510_v9 = vld [vmem:[%s801_s11 + $0x18] sm:$0xf0] }
  0x36   : > { %v509_v12 = vor.u32 %v526_v7, %v508_v4  ;;  %v513_v13 = vor.u32 %v525_v8, %v510_v9  ;;  %v500_v14 = vld [vmem:[%s801_s11] sm:$0xf]  ;;  %v524_v15 = vld [vmem:[%s801_s11 + $0x4] sm:$0xf0]  ;;  %v523_v16 = vld [vmem:[%s801_s11 + $0x4] sm:$0xf] }
  0x37   : > { %v302_v5 = vpack.c.b16 %v296_v2, %v296_v2  ;;  %v303_v6 = vpack.c.b16 %v297_v3, %v297_v3  ;;  %v502_v17 = vld [vmem:[%s801_s11 + $0x8] sm:$0xf0]  ;;  %v501_v18 = vor.u32 %v524_v15, %v500_v14  ;;  %v277_v20 = vld [vmem:[%s876_s0] sm:$0xf]  ;;  %vm352_vm3 = vcmask 7168   ;;  %p516_p6 = scmp.ne.s32.totalorder %s740_s25, 1 }
  0x38   : > { %v505_v19 = vor.u32 %v523_v16, %v502_v17 }
  0x39   : > { %v314_v10 = vsel %vm312_vm1, %v302_v5, 0  ;;  %v317_v11 = vsel %vm312_vm1, %v303_v6, 0  ;;  %v347_v29 = vld [vmem:[#allocation2] sm:$0xff] }
  0x3a   : > { %324 = vmatpush.bf16.msra.mxu0 %v314_v10  ;;  %337 = vmatpush.bf16.msra.mxu1 %v317_v11  ;;  %v354_v32 = vld [vmem:[#allocation3] sm:$0xff] }
  0x3e   : > { %325 = vmatpush.bf16.msra.mxu0 %v509_v12  ;;  %338 = vmatpush.bf16.msra.mxu1 %v513_v13 }
  0x42   : > { %326 = vmatpush.bf16.msra.mxu0 %v501_v18  ;;  %339 = vmatpush.bf16.msra.mxu1 %v505_v19 }
  0x45   : > { %514 = vmatmul.msk.bf16.vlgmr.msra.gmra.mxu0 %vm308_vm2, %v277_v20  ;;  %515 = vmatmul.msk.bf16.vlgmr.msra.gmra.mxu1 %vm308_vm2, %v277_v20 }
  0xc2   : > { %v328_v21 = vpop.f32.mrf.mxu0  ;;  %v341_v22 = vpop.f32.mrf.mxu1 }
  0xc3   : > { %345 = vst [vmem:[%s808_s17] sm:$0xff] %v328_v21  ;;  %v348_v23 = vadd.f32 %v341_v22, %v328_v21  ;;  %v355_v24 = vmul.f32 %v328_v21, %v328_v21  ;;  %v356_v25 = vmul.f32 %v341_v22, %v341_v22 }
  0xc4   : > { %346 = vst [vmem:[%s808_s17 + $0x8] sm:$0xff] %v341_v22 }
  0xc5   : > { %349 = vadd.xlane.f32.xlu0 %v348_v23  ;;  %v357_v28 = vadd.f32 %v356_v25, %v355_v24 }
  0xca   : > { %v330_v26 = vpop.f32.mrf.mxu0  ;;  %v343_v27 = vpop.f32.mrf.mxu1 }
  0xcd   : > { %358 = vadd.xlane.f32.xlu0 %v357_v28 }
 0x138   : > { %v350_v30 = vpop.xlane.xlu0 %349 }
 0x139   : > { %v351_v31 = vadd.f32 %v350_v30, %v347_v29 }
 0x13b   : > { %353 = vst.msk [vmem:[#allocation2] sm:$0xff] %vm352_vm3, %v351_v31 }
 0x13f   : > { %365 = sbr.rel (%p516_p6) target bundleno = 364 (0x16c), region = 48 }
 0x140   : > { %v359_v33 = vpop.xlane.xlu0 %358 }
 0x141   : > { %v360_v34 = vadd.f32 %v359_v33, %v354_v32 }
 0x143   : > { %361 = vst.msk [vmem:[#allocation3] sm:$0xff] %vm352_vm3, %v360_v34 }
 0x144   : > { %v366_v35 = vld [vmem:[#allocation2] sm:$0xff] }
 0x145   : > { %v367_v37 = vmul.f32 0.001953125, %v366_v35  ;;  %v373_v48 = vld [vmem:[%s878_s2] sm:$0xff] }
 0x146   : > { %v387_v52 = vld [vmem:[%s879_s3] sm:$0xff] }
 0x147   : > { %v370_v39 = vmul.f32 %v367_v37, %v367_v37 }
 0x14a   : > { %v368_v36 = vld [vmem:[#allocation3] sm:$0xff] }
 0x14b   : > { %v369_v38 = vmul.f32 0.001953125, %v368_v36 }
 0x14d   : > { %v371_v40 = vsub.f32 %v369_v38, %v370_v39 }
 0x14f   : > { %v372_v41 = vmax.f32 %v371_v40, 0.0 }
 0x151   : > { %v374_v42 = vadd.f32 1e-05, %v372_v41 }
 0x153   : > { %580 = vrsqrt.f32 %v374_v42  ;;  %vm381_vm4 = vweird.f32 %v374_v42 }
 0x159   : > { %v581_v43 = vpop.eup %580 }
 0x15a   : > { %v376_v44 = vmul.f32 %v581_v43, %v374_v42  ;;  %vm382_vm5 = vweird.f32 %v581_v43 }
 0x15b   : > { %vm383_vm6 = vmor %vm381_vm4, %vm382_vm5 }
 0x15c   : > { %v377_v45 = vmul.f32 %v581_v43, %v376_v44 }
 0x15e   : > { %v378_v46 = vmul.f32 0.5, %v377_v45 }
 0x160   : > { %v379_v47 = vsub.f32 1.5, %v378_v46 }
 0x162   : > { %v380_v49 = vmul.f32 %v581_v43, %v379_v47 }
 0x164   : > { %v384_v50 = vsel %vm383_vm6, %v581_v43, %v380_v49 }
 0x165   : > { %v385_v51 = vmul.f32 %v384_v50, %v373_v48 }
 0x167   : > { %386 = vst.msk [vmem:[%s881_s5] sm:$0xff] %vm352_vm3, %v385_v51  ;;  %v388_v53 = vmul.f32 %v385_v51, %v367_v37 }
 0x169   : > { %v389_v54 = vsub.f32 %v387_v52, %v388_v53 }
 0x16b   : > { %390 = vst.msk [vmem:[%s882_s6] sm:$0xff] %vm352_vm3, %v389_v54 }
 0x16c PF: > { %s527_s28 = sshll.u32 %s740_s25, 4  ;;  %s405_s19 = sshll.u32 %s808_s17, 4  ;;  %s406_s19 = int_to_ptr.vmem [resolvable:$true] %s405_s19 }
 0x16d   : > { %s403_s7 = scalar_lea.hbm %s880_s4, %s527_s28  ;;  %s392_s13 = scalar_lea.sflag [#allocation6], %s797_s29 }
 0x16e   : > { %s407_s20 = sshll.u32 %s403_s7, 4  ;;  %s632_s25 = scalar_lea.hbm %s880_s4, 32  ;;  %s408_s20 = int_to_ptr.hbm [resolvable:$true] %s407_s20 }
 0x16f   : > { %s626_s14 = sshra.s32 %s408_s20, 4  ;;  %s627_s14 = int_to_ptr.hbm [resolvable:$true] %s626_s14 }
 0x170   : > { %s628_s15 = scalar_lea.hbm %s627_s14, 16  ;;  %p633_p5 = scmp.lt.s32.totalorder %s627_s14, %s880_s4 }
 0x171   : > { %p629_p0 = scmp.ne.s32.totalorder %s627_s14, %s628_s15  ;;  %p634_p7 = scmp.lt.s32.totalorder %s632_s25, %s628_s15 }
 0x173   : > { %p630_p3 = pnand %p629_p0, %p765_p11  ;;  %p635_p8 = por %p634_p7, %p633_p5 }
 0x175   : > { %p631_p4 = pneg %p630_p3 }
 0x177   : > { %p636_p10 = pnand %p635_p8, %p631_p4 }
 0x179   : > { %639 = shalt.err (!%p636_p10)
}
 0x17a   : > { %532 = dma.vmem_to_hbm [thread:$0]  (%p765_p11), %s406_s19, 256, %s408_s20, %s392_s13  }
 0x17b PF: > { %s431_s29 = sand.u32 1, %s666_s21   ;;  %p539_p1 = pnand %p492_p9, %p769_p12 }
 0x17c   : > { %s432_s17 = scalar_lea.sflag [#allocation6], %s431_s29 }
 0x17d   : > { %p540_p2 = pneg %p539_p1 }
 0x17f   : > { %661 = dma.done.wait (%p540_p2), %s432_s17, 256  }
 0x180   : > { %663 = vsyncadd (%p540_p2), %s432_s17, 4294967040  ;;  %p20_p13 = scmp.ge.s32.totalorder %s744_s27, 4   ;;  %s887_s21 = smov %s670_s22 }
 0x181   : > { %s888_s22 = smov %s674_s23  ;;  %s889_s23 = smov %s756_s30 }
 0x182   : > { %s890_s24 = smov %s744_s27  ;;  %22 = sbr.rel (!%p20_p13) target bundleno = 5 (0x5), region = 105 }
 0x187   :  { %438 = vsyncpa [#allocation5], 1 }
 0x188   :  { %440 = vsyncpa [#allocation5 + $0x1], 1 }
 0x189   :  { %441 = vsyncpa [#allocation6], 1 }
 0x18a   :  { %443 = vsyncpa [#allocation6 + $0x1], 1 }

</bundles_post_ra>
